<compile_context>
chip_gen: v7x
topology: tpu7x:2x2x1
jax: 0.10.0
libtpu: 0.0.40
codegen_flags: <defaults>
</compile_context>

<pallas_src>
import jax
import jax.numpy as jnp
from jax.experimental import pallas as pl
from jax.experimental.pallas import tpu as pltpu

LANES = 128
SLAB = 8                                  # rows per inner step == accumulator height
TARGET_TILE_BYTES = 2 * 1024 * 1024       # logits+labels bytes per pipeline buffer
VMEM_LIMIT_BYTES = 32 * 1024 * 1024       # safe on v5e/v6e (128 MiB) and v7x (64 MiB)


def _cdiv(a, b):
    return -(-a // b)


def _round_up(x, m):
    return _cdiv(x, m) * m


def _make_kernel(*, C, tr, slab, n_slabs, T, R, ragged):
    """Build the kernel with all shape-derived constants baked in."""

    def kernel(logits_ref, labels_ref, pos_loss_ref, pos_cnt_ref, neg_loss_ref):
        # logits_ref: (C, tr, 128)   labels_ref: (tr, 128) int32
        # outputs   : (C, slab, 128) f32 each -- resident elementwise accumulators.
        t = pl.program_id(2)

        @pl.when(t == 0)
        def _init():
            pos_loss_ref[...] = jnp.zeros_like(pos_loss_ref)
            pos_cnt_ref[...] = jnp.zeros_like(pos_cnt_ref)
            neg_loss_ref[...] = jnp.zeros_like(neg_loss_ref)

        # First global row of this tile (unclamped -- overhang blocks mask everything).
        base = (pl.program_id(1) * T + t) * tr

        def accumulate(masked):
            row_iota = (jax.lax.broadcasted_iota(jnp.int32, (slab, LANES), 0)
                        if masked else None)
            for c in range(C):

                def slab_body(i, carry):
                    a_pl, a_pc, a_nl = carry
                    row0 = i * slab
                    if not isinstance(row0, int):
                        row0 = pl.multiple_of(row0, slab)
                    x = logits_ref[c, pl.ds(row0, slab), :].astype(jnp.float32)
                    lab = labels_ref[pl.ds(row0, slab), :]
                    eq = lab == (c + 1)
                    # Stable BCE-with-logits:
                    #   target 1 -> softplus(-x); target 0 -> softplus(x) = softplus(-x) + x
                    sp_pos = jnp.maximum(-x, 0.0) + jnp.log(1.0 + jnp.exp(-jnp.abs(x)))
                    sp_neg = sp_pos + x
                    if masked:
                        valid = row_iota < (R - base - row0)     # rows past R are garbage
                        is_pos = jnp.logical_and(eq, valid)
                        neg_term = jnp.where(
                            jnp.logical_and(jnp.logical_not(eq), valid), sp_neg, 0.0)
                    else:
                        is_pos = eq
                        neg_term = jnp.where(eq, 0.0, sp_neg)
                    a_pl = a_pl + jnp.where(is_pos, sp_pos, 0.0)
                    a_pc = a_pc + jnp.where(is_pos, 1.0, 0.0)
                    a_nl = a_nl + neg_term
                    return a_pl, a_pc, a_nl

                zero = jnp.zeros((slab, LANES), jnp.float32)
                if n_slabs == 1:
                    a_pl, a_pc, a_nl = slab_body(0, (zero, zero, zero))
                else:
                    a_pl, a_pc, a_nl = jax.lax.fori_loop(
                        0, n_slabs, slab_body, (zero, zero, zero),
                        unroll=min(4, n_slabs))
                pos_loss_ref[c] += a_pl
                pos_cnt_ref[c] += a_pc
                neg_loss_ref[c] += a_nl

        if ragged:
            @pl.when(base + tr <= R)
            def _full_tile():
                accumulate(masked=False)

            @pl.when(base + tr > R)
            def _tail_tile():
                accumulate(masked=True)
        else:
            accumulate(masked=False)

    return kernel


def joint_seg_train_loss(point_logits, point_labels, w_neg=1):
    """point_logits: (B, C, H, W) float; point_labels: (B, H, W) int.

    Matches JointSegTrainLoss.forward (w_neg is accepted but unused, as in the module).
    """
    B, C, H, W = point_logits.shape
    HW = H * W

    logits = point_logits.reshape(B, C, HW)
    labels = point_labels.reshape(B, HW)
    if labels.dtype != jnp.int32:
        labels = labels.astype(jnp.int32)

    # Spatial axis padded to a lane multiple only when ragged; padding is value-neutral:
    #   logits -> -huge (softplus(pad) == 0 exactly; the "positive" branch is selected away)
    #   labels -> 0     (never equal to any class id c+1)
    HW_pad = _round_up(HW, LANES)
    if HW_pad != HW:
        # TODO(synk): this fallback costs one HBM copy; common H*W are already 128-multiples.
        pad_val = -0.5 * float(jnp.finfo(logits.dtype).max)
        logits = jnp.pad(logits, ((0, 0), (0, 0), (0, HW_pad - HW)), constant_values=pad_val)
        labels = jnp.pad(labels, ((0, 0), (0, HW_pad - HW)), constant_values=0)
    R = HW_pad // LANES

    # Metadata-only reshapes: pixels land on sublanes -> full (8,128) vreg occupancy for any C.
    logits4 = logits.reshape(B, C, R, LANES)
    labels3 = labels.reshape(B, R, LANES)

    # --- Row-tile sizing (byte-budget driven; double-buffered by the Pallas pipeline). ---
    itemsize = jnp.dtype(logits4.dtype).itemsize
    if R <= SLAB:
        tr = R
        slab = R
    else:
        slab = SLAB
        bytes_per_row = LANES * (C * itemsize + 4)   # logits rows (all classes) + labels row
        tr = (TARGET_TILE_BYTES // bytes_per_row) // slab * slab
        if B % 2 == 1:
            # Keep >= 2 row blocks so v7x's second TensorCore gets work when B is odd/1.
            tr = min(tr, _round_up(_cdiv(R, 2), slab))
        tr = int(max(slab, min(tr, (R // slab) * slab)))
    n_slabs = tr // slab
    acc_r = slab

    num_row_blocks = _cdiv(R, tr)
    NS = 2 if (B % 2 == 1 and num_row_blocks >= 2) else 1    # extra "parallel" spatial split
    T = _cdiv(num_row_blocks, NS)
    clamp_rb = NS * T > num_row_blocks                       # overhang block(s): clamp + full mask
    ragged = NS * T * tr != R

    def rb_idx(s, t):
        rb = s * T + t
        if clamp_rb:
            rb = jnp.minimum(rb, num_row_blocks - 1)
        return rb

    kernel = _make_kernel(C=C, tr=tr, slab=slab, n_slabs=n_slabs, T=T, R=R, ragged=ragged)

    acc_shape = jax.ShapeDtypeStruct((B, NS, C, acc_r, LANES), jnp.float32)
    acc_spec = pl.BlockSpec((None, None, C, acc_r, LANES), lambda b, s, t: (b, s, 0, 0, 0))

    cost = pl.CostEstimate(
        flops=15 * B * C * HW,
        transcendentals=2 * B * C * HW,
        bytes_accessed=B * C * HW_pad * itemsize + B * HW_pad * 4
        + 3 * B * NS * C * acc_r * LANES * 4,
    )

    pos_loss, pos_cnt, neg_loss = pl.pallas_call(
        kernel,
        out_shape=(acc_shape, acc_shape, acc_shape),
        grid=(B, NS, T),
        in_specs=[
            pl.BlockSpec((None, C, tr, LANES), lambda b, s, t: (b, 0, rb_idx(s, t), 0)),
            pl.BlockSpec((None, tr, LANES), lambda b, s, t: (b, rb_idx(s, t), 0)),
        ],
        out_specs=(acc_spec, acc_spec, acc_spec),
        compiler_params=pltpu.CompilerParams(
            dimension_semantics=("parallel", "parallel", "arbitrary"),
            vmem_limit_bytes=VMEM_LIMIT_BYTES,
        ),
        cost_estimate=cost,
    )(logits4, labels3)

    # Tiny finalize in plain JAX on the (B, NS, C, 8, 128) per-lane partial sums.
    pos_loss = jnp.sum(pos_loss, axis=(0, 1, 3, 4))          # (C,)
    pos_cnt = jnp.sum(pos_cnt, axis=(0, 1, 3, 4))
    neg_loss = jnp.sum(neg_loss, axis=(0, 1, 3, 4))
    neg_cnt = jnp.float32(B * HW) - pos_cnt                  # derived; no 4th accumulator
    # Note: a class with zero positive pixels gives 0/0 = NaN, matching PyTorch mean-of-empty.
    per_class = 0.2 * pos_loss / pos_cnt + 0.8 * neg_loss / neg_cnt
    return jnp.sum(per_class)


def _ref_loss(point_logits, point_labels):
    """Pure-JAX reference mirroring the PyTorch forward."""
    B, C, H, W = point_logits.shape
    x = point_logits.astype(jnp.float32)
    total = jnp.float32(0.0)
    for i in range(C):
        preds = x[:, i]
        pos_f = (point_labels == i + 1).astype(jnp.float32)
        neg_f = 1.0 - pos_f
        sp_pos = jax.nn.softplus(-preds)   # BCE-with-logits, target 1
        sp_neg = jax.nn.softplus(preds)    # BCE-with-logits, target 0
        pos_mean = jnp.sum(sp_pos * pos_f) / jnp.sum(pos_f)
        neg_mean = jnp.sum(sp_neg * neg_f) / jnp.sum(neg_f)
        total = total + 0.2 * pos_mean + 0.8 * neg_mean
    return total


if __name__ == "__main__":
    def _check(B, C, H, W, dtype=jnp.float32, rtol=5e-4):
        key = jax.random.PRNGKey(0)
        k1, k2 = jax.random.split(key)
        logits = jax.random.normal(k1, (B, C, H, W), dtype=jnp.float32).astype(dtype)
        labels = jax.random.randint(k2, (B, H, W), 0, C + 1, dtype=jnp.int32)
        # Ensure every class 1..C has at least one positive pixel (the PyTorch module
        # implicitly assumes non-empty positive sets; an empty mean would be NaN).
        labels = labels.at[0, 0, :C].set(jnp.arange(1, C + 1, dtype=jnp.int32))
        out = joint_seg_train_loss(logits, labels)
        jax.block_until_ready(out)
        ref = _ref_loss(logits, labels)
        assert jnp.isfinite(out), ((B, C, H, W), float(out))
        assert jnp.allclose(out, ref, rtol=rtol, atol=1e-5), (
            (B, C, H, W, str(jnp.dtype(dtype))), float(out), float(ref))

    _check(2, 4, 16, 16)                        # spec-sized; small-R (<8 rows) path
    _check(1, 3, 40, 40)                        # ragged H*W (neutral pad) + 2-way spatial split
    _check(2, 3, 64, 64, dtype=jnp.bfloat16)    # bf16 logits, multi-slab fori path
    _check(1, 4, 512, 512)                      # masked tail tile + clamped overhang block
    print("KERNEL_OK")
</pallas_src>

<mosaic_0001>
module attributes {stable_mosaic.version = 11 : i64} {
  func.func @kernel(%arg0: i32, %arg1: i32, %arg2: i32, %arg3: memref<1x4x2x128xf32, #tpu.memory_space<vmem>>, %arg4: memref<1x2x128xi32, #tpu.memory_space<vmem>>, %arg5: memref<1x1x4x2x128xf32, #tpu.memory_space<vmem>>, %arg6: memref<1x1x4x2x128xf32, #tpu.memory_space<vmem>>, %arg7: memref<1x1x4x2x128xf32, #tpu.memory_space<vmem>>) attributes {dimension_semantics = [#tpu.dimension_semantics<parallel>, #tpu.dimension_semantics<parallel>, #tpu.dimension_semantics<arbitrary>], iteration_bounds = array<i64: 2, 1, 1>, scalar_prefetch = 0 : i64, scratch_operands = 0 : i64, tpu.core_type = #tpu.core_type<tc>, window_params = [{transform_indices = @transform_0, window_bounds = array<i64: 1, 4, 2, 128>}, {transform_indices = @transform_1, window_bounds = array<i64: 1, 2, 128>}, {transform_indices = @transform_2, window_bounds = array<i64: 1, 1, 4, 2, 128>}, {transform_indices = @transform_3, window_bounds = array<i64: 1, 1, 4, 2, 128>}, {transform_indices = @transform_4, window_bounds = array<i64: 1, 1, 4, 2, 128>}]} {
    %c0_i32 = arith.constant 0 : i32
    %0 = arith.cmpi eq, %arg2, %c0_i32 : i32
    %1 = arith.extui %0 : i1 to i32
    %c0_i32_0 = arith.constant 0 : i32
    %2 = arith.cmpi ne, %1, %c0_i32_0 : i32
    scf.if %2 {
      %cst_180 = arith.constant 0.000000e+00 : f32
      %195 = vector.broadcast %cst_180 : f32 to vector<4x2x128xf32>
      %c0_181 = arith.constant 0 : index
      %c0_182 = arith.constant 0 : index
      %c0_183 = arith.constant 0 : index
      %c0_184 = arith.constant 0 : index
      %c0_185 = arith.constant 0 : index
      %196 = vector.load %arg5[%c0_181, %c0_182, %c0_183, %c0_184, %c0_185] : memref<1x1x4x2x128xf32, #tpu.memory_space<vmem>>, vector<1x1x4x2x128xf32>
      %197 = vector.shape_cast %196 : vector<1x1x4x2x128xf32> to vector<4x2x128xf32>
      %198 = vector.shape_cast %195 : vector<4x2x128xf32> to vector<1x1x4x2x128xf32>
      tpu.vector_store %arg5[%c0_181, %c0_182, %c0_183, %c0_184, %c0_185], %198 {strides = array<i32>} : memref<1x1x4x2x128xf32, #tpu.memory_space<vmem>>, vector<1x1x4x2x128xf32>,
      %cst_186 = arith.constant 0.000000e+00 : f32
      %199 = vector.broadcast %cst_186 : f32 to vector<4x2x128xf32>
      %c0_187 = arith.constant 0 : index
      %c0_188 = arith.constant 0 : index
      %c0_189 = arith.constant 0 : index
      %c0_190 = arith.constant 0 : index
      %c0_191 = arith.constant 0 : index
      %200 = vector.load %arg6[%c0_187, %c0_188, %c0_189, %c0_190, %c0_191] : memref<1x1x4x2x128xf32, #tpu.memory_space<vmem>>, vector<1x1x4x2x128xf32>
      %201 = vector.shape_cast %200 : vector<1x1x4x2x128xf32> to vector<4x2x128xf32>
      %202 = vector.shape_cast %199 : vector<4x2x128xf32> to vector<1x1x4x2x128xf32>
      tpu.vector_store %arg6[%c0_187, %c0_188, %c0_189, %c0_190, %c0_191], %202 {strides = array<i32>} : memref<1x1x4x2x128xf32, #tpu.memory_space<vmem>>, vector<1x1x4x2x128xf32>,
      %cst_192 = arith.constant 0.000000e+00 : f32
      %203 = vector.broadcast %cst_192 : f32 to vector<4x2x128xf32>
      %c0_193 = arith.constant 0 : index
      %c0_194 = arith.constant 0 : index
      %c0_195 = arith.constant 0 : index
      %c0_196 = arith.constant 0 : index
      %c0_197 = arith.constant 0 : index
      %204 = vector.load %arg7[%c0_193, %c0_194, %c0_195, %c0_196, %c0_197] : memref<1x1x4x2x128xf32, #tpu.memory_space<vmem>>, vector<1x1x4x2x128xf32>
      %205 = vector.shape_cast %204 : vector<1x1x4x2x128xf32> to vector<4x2x128xf32>
      %206 = vector.shape_cast %203 : vector<4x2x128xf32> to vector<1x1x4x2x128xf32>
      tpu.vector_store %arg7[%c0_193, %c0_194, %c0_195, %c0_196, %c0_197], %206 {strides = array<i32>} : memref<1x1x4x2x128xf32, #tpu.memory_space<vmem>>, vector<1x1x4x2x128xf32>,
    } else {
    }
    %cst = arith.constant 0.000000e+00 : f32
    %3 = vector.broadcast %cst : f32 to vector<2x128xf32>
    %c0 = arith.constant 0 : index
    %c0_1 = arith.constant 0 : index
    %c0_2 = arith.constant 0 : index
    %c0_3 = arith.constant 0 : index
    %4 = vector.load %arg3[%c0, %c0_1, %c0_2, %c0_3] : memref<1x4x2x128xf32, #tpu.memory_space<vmem>>, vector<1x1x2x128xf32>
    %5 = vector.shape_cast %4 : vector<1x1x2x128xf32> to vector<2x128xf32>
    %c0_4 = arith.constant 0 : index
    %c0_5 = arith.constant 0 : index
    %c0_6 = arith.constant 0 : index
    %6 = vector.load %arg4[%c0_4, %c0_5, %c0_6] : memref<1x2x128xi32, #tpu.memory_space<vmem>>, vector<1x2x128xi32>
    %7 = vector.shape_cast %6 : vector<1x2x128xi32> to vector<2x128xi32>
    %c1_i32 = arith.constant 1 : i32
    %8 = vector.broadcast %c1_i32 : i32 to vector<2x128xi32>
    %9 = arith.cmpi eq, %7, %8 : vector<2x128xi32>
    %cst_7 = arith.constant 0.000000e+00 : f32
    %10 = vector.broadcast %cst_7 : f32 to vector<2x128xf32>
    %11 = arith.subf %10, %5 : vector<2x128xf32>
    %cst_8 = arith.constant 0.000000e+00 : f32
    %12 = vector.broadcast %cst_8 : f32 to vector<2x128xf32>
    %13 = arith.maximumf %11, %12 : vector<2x128xf32>
    %14 = math.absf %5 : vector<2x128xf32>
    %cst_9 = arith.constant 0.000000e+00 : f32
    %15 = vector.broadcast %cst_9 : f32 to vector<2x128xf32>
    %16 = arith.subf %15, %14 : vector<2x128xf32>
    %17 = math.exp %16 : vector<2x128xf32>
    %cst_10 = arith.constant 1.000000e+00 : f32
    %18 = vector.broadcast %cst_10 : f32 to vector<2x128xf32>
    %19 = arith.addf %18, %17 : vector<2x128xf32>
    %20 = math.log %19 : vector<2x128xf32>
    %21 = arith.addf %13, %20 : vector<2x128xf32>
    %22 = arith.addf %21, %5 : vector<2x128xf32>
    %cst_11 = arith.constant 0.000000e+00 : f32
    %23 = vector.broadcast %cst_11 : f32 to vector<2x128xf32>
    %24 = arith.select %9, %23, %22 : vector<2x128xi1>, vector<2x128xf32>
    %cst_12 = arith.constant 0.000000e+00 : f32
    %25 = vector.broadcast %cst_12 : f32 to vector<2x128xf32>
    %26 = arith.select %9, %21, %25 : vector<2x128xi1>, vector<2x128xf32>
    %27 = arith.addf %3, %26 : vector<2x128xf32>
    %cst_13 = arith.constant 1.000000e+00 : f32
    %cst_14 = arith.constant 0.000000e+00 : f32
    %28 = vector.broadcast %cst_13 : f32 to vector<2x128xf32>
    %29 = vector.broadcast %cst_14 : f32 to vector<2x128xf32>
    %30 = arith.select %9, %28, %29 : vector<2x128xi1>, vector<2x128xf32>
    %31 = arith.addf %3, %30 : vector<2x128xf32>
    %32 = arith.addf %3, %24 : vector<2x128xf32>
    %c0_15 = arith.constant 0 : index
    %c0_16 = arith.constant 0 : index
    %c0_17 = arith.constant 0 : index
    %c0_18 = arith.constant 0 : index
    %c0_19 = arith.constant 0 : index
    %33 = vector.load %arg5[%c0_15, %c0_16, %c0_17, %c0_18, %c0_19] : memref<1x1x4x2x128xf32, #tpu.memory_space<vmem>>, vector<1x1x1x2x128xf32>
    %34 = vector.shape_cast %33 : vector<1x1x1x2x128xf32> to vector<2x128xf32>
    %35 = arith.addf %34, %27 : vector<2x128xf32>
    %c0_20 = arith.constant 0 : index
    %c0_21 = arith.constant 0 : index
    %c0_22 = arith.constant 0 : index
    %c0_23 = arith.constant 0 : index
    %c0_24 = arith.constant 0 : index
    %36 = vector.load %arg5[%c0_20, %c0_21, %c0_22, %c0_23, %c0_24] : memref<1x1x4x2x128xf32, #tpu.memory_space<vmem>>, vector<1x1x1x2x128xf32>
    %37 = vector.shape_cast %36 : vector<1x1x1x2x128xf32> to vector<2x128xf32>
    %38 = vector.shape_cast %35 : vector<2x128xf32> to vector<1x1x1x2x128xf32>
    tpu.vector_store %arg5[%c0_20, %c0_21, %c0_22, %c0_23, %c0_24], %38 {strides = array<i32>} : memref<1x1x4x2x128xf32, #tpu.memory_space<vmem>>, vector<1x1x1x2x128xf32>,
    %c0_25 = arith.constant 0 : index
    %c0_26 = arith.constant 0 : index
    %c0_27 = arith.constant 0 : index
    %c0_28 = arith.constant 0 : index
    %c0_29 = arith.constant 0 : index
    %39 = vector.load %arg6[%c0_25, %c0_26, %c0_27, %c0_28, %c0_29] : memref<1x1x4x2x128xf32, #tpu.memory_space<vmem>>, vector<1x1x1x2x128xf32>
    %40 = vector.shape_cast %39 : vector<1x1x1x2x128xf32> to vector<2x128xf32>
    %41 = arith.addf %40, %31 : vector<2x128xf32>
    %c0_30 = arith.constant 0 : index
    %c0_31 = arith.constant 0 : index
    %c0_32 = arith.constant 0 : index
    %c0_33 = arith.constant 0 : index
    %c0_34 = arith.constant 0 : index
    %42 = vector.load %arg6[%c0_30, %c0_31, %c0_32, %c0_33, %c0_34] : memref<1x1x4x2x128xf32, #tpu.memory_space<vmem>>, vector<1x1x1x2x128xf32>
    %43 = vector.shape_cast %42 : vector<1x1x1x2x128xf32> to vector<2x128xf32>
    %44 = vector.shape_cast %41 : vector<2x128xf32> to vector<1x1x1x2x128xf32>
    tpu.vector_store %arg6[%c0_30, %c0_31, %c0_32, %c0_33, %c0_34], %44 {strides = array<i32>} : memref<1x1x4x2x128xf32, #tpu.memory_space<vmem>>, vector<1x1x1x2x128xf32>,
    %c0_35 = arith.constant 0 : index
    %c0_36 = arith.constant 0 : index
    %c0_37 = arith.constant 0 : index
    %c0_38 = arith.constant 0 : index
    %c0_39 = arith.constant 0 : index
    %45 = vector.load %arg7[%c0_35, %c0_36, %c0_37, %c0_38, %c0_39] : memref<1x1x4x2x128xf32, #tpu.memory_space<vmem>>, vector<1x1x1x2x128xf32>
    %46 = vector.shape_cast %45 : vector<1x1x1x2x128xf32> to vector<2x128xf32>
    %47 = arith.addf %46, %32 : vector<2x128xf32>
    %c0_40 = arith.constant 0 : index
    %c0_41 = arith.constant 0 : index
    %c0_42 = arith.constant 0 : index
    %c0_43 = arith.constant 0 : index
    %c0_44 = arith.constant 0 : index
    %48 = vector.load %arg7[%c0_40, %c0_41, %c0_42, %c0_43, %c0_44] : memref<1x1x4x2x128xf32, #tpu.memory_space<vmem>>, vector<1x1x1x2x128xf32>
    %49 = vector.shape_cast %48 : vector<1x1x1x2x128xf32> to vector<2x128xf32>
    %50 = vector.shape_cast %47 : vector<2x128xf32> to vector<1x1x1x2x128xf32>
    tpu.vector_store %arg7[%c0_40, %c0_41, %c0_42, %c0_43, %c0_44], %50 {strides = array<i32>} : memref<1x1x4x2x128xf32, #tpu.memory_space<vmem>>, vector<1x1x1x2x128xf32>,
    %cst_45 = arith.constant 0.000000e+00 : f32
    %51 = vector.broadcast %cst_45 : f32 to vector<2x128xf32>
    %c0_46 = arith.constant 0 : index
    %c1 = arith.constant 1 : index
    %c0_47 = arith.constant 0 : index
    %c0_48 = arith.constant 0 : index
    %52 = vector.load %arg3[%c0_46, %c1, %c0_47, %c0_48] : memref<1x4x2x128xf32, #tpu.memory_space<vmem>>, vector<1x1x2x128xf32>
    %53 = vector.shape_cast %52 : vector<1x1x2x128xf32> to vector<2x128xf32>
    %c0_49 = arith.constant 0 : index
    %c0_50 = arith.constant 0 : index
    %c0_51 = arith.constant 0 : index
    %54 = vector.load %arg4[%c0_49, %c0_50, %c0_51] : memref<1x2x128xi32, #tpu.memory_space<vmem>>, vector<1x2x128xi32>
    %55 = vector.shape_cast %54 : vector<1x2x128xi32> to vector<2x128xi32>
    %c2_i32 = arith.constant 2 : i32
    %56 = vector.broadcast %c2_i32 : i32 to vector<2x128xi32>
    %57 = arith.cmpi eq, %55, %56 : vector<2x128xi32>
    %cst_52 = arith.constant 0.000000e+00 : f32
    %58 = vector.broadcast %cst_52 : f32 to vector<2x128xf32>
    %59 = arith.subf %58, %53 : vector<2x128xf32>
    %cst_53 = arith.constant 0.000000e+00 : f32
    %60 = vector.broadcast %cst_53 : f32 to vector<2x128xf32>
    %61 = arith.maximumf %59, %60 : vector<2x128xf32>
    %62 = math.absf %53 : vector<2x128xf32>
    %cst_54 = arith.constant 0.000000e+00 : f32
    %63 = vector.broadcast %cst_54 : f32 to vector<2x128xf32>
    %64 = arith.subf %63, %62 : vector<2x128xf32>
    %65 = math.exp %64 : vector<2x128xf32>
    %cst_55 = arith.constant 1.000000e+00 : f32
    %66 = vector.broadcast %cst_55 : f32 to vector<2x128xf32>
    %67 = arith.addf %66, %65 : vector<2x128xf32>
    %68 = math.log %67 : vector<2x128xf32>
    %69 = arith.addf %61, %68 : vector<2x128xf32>
    %70 = arith.addf %69, %53 : vector<2x128xf32>
    %cst_56 = arith.constant 0.000000e+00 : f32
    %71 = vector.broadcast %cst_56 : f32 to vector<2x128xf32>
    %72 = arith.select %57, %71, %70 : vector<2x128xi1>, vector<2x128xf32>
    %cst_57 = arith.constant 0.000000e+00 : f32
    %73 = vector.broadcast %cst_57 : f32 to vector<2x128xf32>
    %74 = arith.select %57, %69, %73 : vector<2x128xi1>, vector<2x128xf32>
    %75 = arith.addf %51, %74 : vector<2x128xf32>
    %cst_58 = arith.constant 1.000000e+00 : f32
    %cst_59 = arith.constant 0.000000e+00 : f32
    %76 = vector.broadcast %cst_58 : f32 to vector<2x128xf32>
    %77 = vector.broadcast %cst_59 : f32 to vector<2x128xf32>
    %78 = arith.select %57, %76, %77 : vector<2x128xi1>, vector<2x128xf32>
    %79 = arith.addf %51, %78 : vector<2x128xf32>
    %80 = arith.addf %51, %72 : vector<2x128xf32>
    %c0_60 = arith.constant 0 : index
    %c0_61 = arith.constant 0 : index
    %c1_62 = arith.constant 1 : index
    %c0_63 = arith.constant 0 : index
    %c0_64 = arith.constant 0 : index
    %81 = vector.load %arg5[%c0_60, %c0_61, %c1_62, %c0_63, %c0_64] : memref<1x1x4x2x128xf32, #tpu.memory_space<vmem>>, vector<1x1x1x2x128xf32>
    %82 = vector.shape_cast %81 : vector<1x1x1x2x128xf32> to vector<2x128xf32>
    %83 = arith.addf %82, %75 : vector<2x128xf32>
    %c0_65 = arith.constant 0 : index
    %c0_66 = arith.constant 0 : index
    %c1_67 = arith.constant 1 : index
    %c0_68 = arith.constant 0 : index
    %c0_69 = arith.constant 0 : index
    %84 = vector.load %arg5[%c0_65, %c0_66, %c1_67, %c0_68, %c0_69] : memref<1x1x4x2x128xf32, #tpu.memory_space<vmem>>, vector<1x1x1x2x128xf32>
    %85 = vector.shape_cast %84 : vector<1x1x1x2x128xf32> to vector<2x128xf32>
    %86 = vector.shape_cast %83 : vector<2x128xf32> to vector<1x1x1x2x128xf32>
    tpu.vector_store %arg5[%c0_65, %c0_66, %c1_67, %c0_68, %c0_69], %86 {strides = array<i32>} : memref<1x1x4x2x128xf32, #tpu.memory_space<vmem>>, vector<1x1x1x2x128xf32>,
    %c0_70 = arith.constant 0 : index
    %c0_71 = arith.constant 0 : index
    %c1_72 = arith.constant 1 : index
    %c0_73 = arith.constant 0 : index
    %c0_74 = arith.constant 0 : index
    %87 = vector.load %arg6[%c0_70, %c0_71, %c1_72, %c0_73, %c0_74] : memref<1x1x4x2x128xf32, #tpu.memory_space<vmem>>, vector<1x1x1x2x128xf32>
    %88 = vector.shape_cast %87 : vector<1x1x1x2x128xf32> to vector<2x128xf32>
    %89 = arith.addf %88, %79 : vector<2x128xf32>
    %c0_75 = arith.constant 0 : index
    %c0_76 = arith.constant 0 : index
    %c1_77 = arith.constant 1 : index
    %c0_78 = arith.constant 0 : index
    %c0_79 = arith.constant 0 : index
    %90 = vector.load %arg6[%c0_75, %c0_76, %c1_77, %c0_78, %c0_79] : memref<1x1x4x2x128xf32, #tpu.memory_space<vmem>>, vector<1x1x1x2x128xf32>
    %91 = vector.shape_cast %90 : vector<1x1x1x2x128xf32> to vector<2x128xf32>
    %92 = vector.shape_cast %89 : vector<2x128xf32> to vector<1x1x1x2x128xf32>
    tpu.vector_store %arg6[%c0_75, %c0_76, %c1_77, %c0_78, %c0_79], %92 {strides = array<i32>} : memref<1x1x4x2x128xf32, #tpu.memory_space<vmem>>, vector<1x1x1x2x128xf32>,
    %c0_80 = arith.constant 0 : index
    %c0_81 = arith.constant 0 : index
    %c1_82 = arith.constant 1 : index
    %c0_83 = arith.constant 0 : index
    %c0_84 = arith.constant 0 : index
    %93 = vector.load %arg7[%c0_80, %c0_81, %c1_82, %c0_83, %c0_84] : memref<1x1x4x2x128xf32, #tpu.memory_space<vmem>>, vector<1x1x1x2x128xf32>
    %94 = vector.shape_cast %93 : vector<1x1x1x2x128xf32> to vector<2x128xf32>
    %95 = arith.addf %94, %80 : vector<2x128xf32>
    %c0_85 = arith.constant 0 : index
    %c0_86 = arith.constant 0 : index
    %c1_87 = arith.constant 1 : index
    %c0_88 = arith.constant 0 : index
    %c0_89 = arith.constant 0 : index
    %96 = vector.load %arg7[%c0_85, %c0_86, %c1_87, %c0_88, %c0_89] : memref<1x1x4x2x128xf32, #tpu.memory_space<vmem>>, vector<1x1x1x2x128xf32>
    %97 = vector.shape_cast %96 : vector<1x1x1x2x128xf32> to vector<2x128xf32>
    %98 = vector.shape_cast %95 : vector<2x128xf32> to vector<1x1x1x2x128xf32>
    tpu.vector_store %arg7[%c0_85, %c0_86, %c1_87, %c0_88, %c0_89], %98 {strides = array<i32>} : memref<1x1x4x2x128xf32, #tpu.memory_space<vmem>>, vector<1x1x1x2x128xf32>,
    %cst_90 = arith.constant 0.000000e+00 : f32
    %99 = vector.broadcast %cst_90 : f32 to vector<2x128xf32>
    %c0_91 = arith.constant 0 : index
    %c2 = arith.constant 2 : index
    %c0_92 = arith.constant 0 : index
    %c0_93 = arith.constant 0 : index
    %100 = vector.load %arg3[%c0_91, %c2, %c0_92, %c0_93] : memref<1x4x2x128xf32, #tpu.memory_space<vmem>>, vector<1x1x2x128xf32>
    %101 = vector.shape_cast %100 : vector<1x1x2x128xf32> to vector<2x128xf32>
    %c0_94 = arith.constant 0 : index
    %c0_95 = arith.constant 0 : index
    %c0_96 = arith.constant 0 : index
    %102 = vector.load %arg4[%c0_94, %c0_95, %c0_96] : memref<1x2x128xi32, #tpu.memory_space<vmem>>, vector<1x2x128xi32>
    %103 = vector.shape_cast %102 : vector<1x2x128xi32> to vector<2x128xi32>
    %c3_i32 = arith.constant 3 : i32
    %104 = vector.broadcast %c3_i32 : i32 to vector<2x128xi32>
    %105 = arith.cmpi eq, %103, %104 : vector<2x128xi32>
    %cst_97 = arith.constant 0.000000e+00 : f32
    %106 = vector.broadcast %cst_97 : f32 to vector<2x128xf32>
    %107 = arith.subf %106, %101 : vector<2x128xf32>
    %cst_98 = arith.constant 0.000000e+00 : f32
    %108 = vector.broadcast %cst_98 : f32 to vector<2x128xf32>
    %109 = arith.maximumf %107, %108 : vector<2x128xf32>
    %110 = math.absf %101 : vector<2x128xf32>
    %cst_99 = arith.constant 0.000000e+00 : f32
    %111 = vector.broadcast %cst_99 : f32 to vector<2x128xf32>
    %112 = arith.subf %111, %110 : vector<2x128xf32>
    %113 = math.exp %112 : vector<2x128xf32>
    %cst_100 = arith.constant 1.000000e+00 : f32
    %114 = vector.broadcast %cst_100 : f32 to vector<2x128xf32>
    %115 = arith.addf %114, %113 : vector<2x128xf32>
    %116 = math.log %115 : vector<2x128xf32>
    %117 = arith.addf %109, %116 : vector<2x128xf32>
    %118 = arith.addf %117, %101 : vector<2x128xf32>
    %cst_101 = arith.constant 0.000000e+00 : f32
    %119 = vector.broadcast %cst_101 : f32 to vector<2x128xf32>
    %120 = arith.select %105, %119, %118 : vector<2x128xi1>, vector<2x128xf32>
    %cst_102 = arith.constant 0.000000e+00 : f32
    %121 = vector.broadcast %cst_102 : f32 to vector<2x128xf32>
    %122 = arith.select %105, %117, %121 : vector<2x128xi1>, vector<2x128xf32>
    %123 = arith.addf %99, %122 : vector<2x128xf32>
    %cst_103 = arith.constant 1.000000e+00 : f32
    %cst_104 = arith.constant 0.000000e+00 : f32
    %124 = vector.broadcast %cst_103 : f32 to vector<2x128xf32>
    %125 = vector.broadcast %cst_104 : f32 to vector<2x128xf32>
    %126 = arith.select %105, %124, %125 : vector<2x128xi1>, vector<2x128xf32>
    %127 = arith.addf %99, %126 : vector<2x128xf32>
    %128 = arith.addf %99, %120 : vector<2x128xf32>
    %c0_105 = arith.constant 0 : index
    %c0_106 = arith.constant 0 : index
    %c2_107 = arith.constant 2 : index
    %c0_108 = arith.constant 0 : index
    %c0_109 = arith.constant 0 : index
    %129 = vector.load %arg5[%c0_105, %c0_106, %c2_107, %c0_108, %c0_109] : memref<1x1x4x2x128xf32, #tpu.memory_space<vmem>>, vector<1x1x1x2x128xf32>
    %130 = vector.shape_cast %129 : vector<1x1x1x2x128xf32> to vector<2x128xf32>
    %131 = arith.addf %130, %123 : vector<2x128xf32>
    %c0_110 = arith.constant 0 : index
    %c0_111 = arith.constant 0 : index
    %c2_112 = arith.constant 2 : index
    %c0_113 = arith.constant 0 : index
    %c0_114 = arith.constant 0 : index
    %132 = vector.load %arg5[%c0_110, %c0_111, %c2_112, %c0_113, %c0_114] : memref<1x1x4x2x128xf32, #tpu.memory_space<vmem>>, vector<1x1x1x2x128xf32>
    %133 = vector.shape_cast %132 : vector<1x1x1x2x128xf32> to vector<2x128xf32>
    %134 = vector.shape_cast %131 : vector<2x128xf32> to vector<1x1x1x2x128xf32>
    tpu.vector_store %arg5[%c0_110, %c0_111, %c2_112, %c0_113, %c0_114], %134 {strides = array<i32>} : memref<1x1x4x2x128xf32, #tpu.memory_space<vmem>>, vector<1x1x1x2x128xf32>,
    %c0_115 = arith.constant 0 : index
    %c0_116 = arith.constant 0 : index
    %c2_117 = arith.constant 2 : index
    %c0_118 = arith.constant 0 : index
    %c0_119 = arith.constant 0 : index
    %135 = vector.load %arg6[%c0_115, %c0_116, %c2_117, %c0_118, %c0_119] : memref<1x1x4x2x128xf32, #tpu.memory_space<vmem>>, vector<1x1x1x2x128xf32>
    %136 = vector.shape_cast %135 : vector<1x1x1x2x128xf32> to vector<2x128xf32>
    %137 = arith.addf %136, %127 : vector<2x128xf32>
    %c0_120 = arith.constant 0 : index
    %c0_121 = arith.constant 0 : index
    %c2_122 = arith.constant 2 : index
    %c0_123 = arith.constant 0 : index
    %c0_124 = arith.constant 0 : index
    %138 = vector.load %arg6[%c0_120, %c0_121, %c2_122, %c0_123, %c0_124] : memref<1x1x4x2x128xf32, #tpu.memory_space<vmem>>, vector<1x1x1x2x128xf32>
    %139 = vector.shape_cast %138 : vector<1x1x1x2x128xf32> to vector<2x128xf32>
    %140 = vector.shape_cast %137 : vector<2x128xf32> to vector<1x1x1x2x128xf32>
    tpu.vector_store %arg6[%c0_120, %c0_121, %c2_122, %c0_123, %c0_124], %140 {strides = array<i32>} : memref<1x1x4x2x128xf32, #tpu.memory_space<vmem>>, vector<1x1x1x2x128xf32>,
    %c0_125 = arith.constant 0 : index
    %c0_126 = arith.constant 0 : index
    %c2_127 = arith.constant 2 : index
    %c0_128 = arith.constant 0 : index
    %c0_129 = arith.constant 0 : index
    %141 = vector.load %arg7[%c0_125, %c0_126, %c2_127, %c0_128, %c0_129] : memref<1x1x4x2x128xf32, #tpu.memory_space<vmem>>, vector<1x1x1x2x128xf32>
    %142 = vector.shape_cast %141 : vector<1x1x1x2x128xf32> to vector<2x128xf32>
    %143 = arith.addf %142, %128 : vector<2x128xf32>
    %c0_130 = arith.constant 0 : index
    %c0_131 = arith.constant 0 : index
    %c2_132 = arith.constant 2 : index
    %c0_133 = arith.constant 0 : index
    %c0_134 = arith.constant 0 : index
    %144 = vector.load %arg7[%c0_130, %c0_131, %c2_132, %c0_133, %c0_134] : memref<1x1x4x2x128xf32, #tpu.memory_space<vmem>>, vector<1x1x1x2x128xf32>
    %145 = vector.shape_cast %144 : vector<1x1x1x2x128xf32> to vector<2x128xf32>
    %146 = vector.shape_cast %143 : vector<2x128xf32> to vector<1x1x1x2x128xf32>
    tpu.vector_store %arg7[%c0_130, %c0_131, %c2_132, %c0_133, %c0_134], %146 {strides = array<i32>} : memref<1x1x4x2x128xf32, #tpu.memory_space<vmem>>, vector<1x1x1x2x128xf32>,
    %cst_135 = arith.constant 0.000000e+00 : f32
    %147 = vector.broadcast %cst_135 : f32 to vector<2x128xf32>
    %c0_136 = arith.constant 0 : index
    %c3 = arith.constant 3 : index
    %c0_137 = arith.constant 0 : index
    %c0_138 = arith.constant 0 : index
    %148 = vector.load %arg3[%c0_136, %c3, %c0_137, %c0_138] : memref<1x4x2x128xf32, #tpu.memory_space<vmem>>, vector<1x1x2x128xf32>
    %149 = vector.shape_cast %148 : vector<1x1x2x128xf32> to vector<2x128xf32>
    %c0_139 = arith.constant 0 : index
    %c0_140 = arith.constant 0 : index
    %c0_141 = arith.constant 0 : index
    %150 = vector.load %arg4[%c0_139, %c0_140, %c0_141] : memref<1x2x128xi32, #tpu.memory_space<vmem>>, vector<1x2x128xi32>
    %151 = vector.shape_cast %150 : vector<1x2x128xi32> to vector<2x128xi32>
    %c4_i32 = arith.constant 4 : i32
    %152 = vector.broadcast %c4_i32 : i32 to vector<2x128xi32>
    %153 = arith.cmpi eq, %151, %152 : vector<2x128xi32>
    %cst_142 = arith.constant 0.000000e+00 : f32
    %154 = vector.broadcast %cst_142 : f32 to vector<2x128xf32>
    %155 = arith.subf %154, %149 : vector<2x128xf32>
    %cst_143 = arith.constant 0.000000e+00 : f32
    %156 = vector.broadcast %cst_143 : f32 to vector<2x128xf32>
    %157 = arith.maximumf %155, %156 : vector<2x128xf32>
    %158 = math.absf %149 : vector<2x128xf32>
    %cst_144 = arith.constant 0.000000e+00 : f32
    %159 = vector.broadcast %cst_144 : f32 to vector<2x128xf32>
    %160 = arith.subf %159, %158 : vector<2x128xf32>
    %161 = math.exp %160 : vector<2x128xf32>
    %cst_145 = arith.constant 1.000000e+00 : f32
    %162 = vector.broadcast %cst_145 : f32 to vector<2x128xf32>
    %163 = arith.addf %162, %161 : vector<2x128xf32>
    %164 = math.log %163 : vector<2x128xf32>
    %165 = arith.addf %157, %164 : vector<2x128xf32>
    %166 = arith.addf %165, %149 : vector<2x128xf32>
    %cst_146 = arith.constant 0.000000e+00 : f32
    %167 = vector.broadcast %cst_146 : f32 to vector<2x128xf32>
    %168 = arith.select %153, %167, %166 : vector<2x128xi1>, vector<2x128xf32>
    %cst_147 = arith.constant 0.000000e+00 : f32
    %169 = vector.broadcast %cst_147 : f32 to vector<2x128xf32>
    %170 = arith.select %153, %165, %169 : vector<2x128xi1>, vector<2x128xf32>
    %171 = arith.addf %147, %170 : vector<2x128xf32>
    %cst_148 = arith.constant 1.000000e+00 : f32
    %cst_149 = arith.constant 0.000000e+00 : f32
    %172 = vector.broadcast %cst_148 : f32 to vector<2x128xf32>
    %173 = vector.broadcast %cst_149 : f32 to vector<2x128xf32>
    %174 = arith.select %153, %172, %173 : vector<2x128xi1>, vector<2x128xf32>
    %175 = arith.addf %147, %174 : vector<2x128xf32>
    %176 = arith.addf %147, %168 : vector<2x128xf32>
    %c0_150 = arith.constant 0 : index
    %c0_151 = arith.constant 0 : index
    %c3_152 = arith.constant 3 : index
    %c0_153 = arith.constant 0 : index
    %c0_154 = arith.constant 0 : index
    %177 = vector.load %arg5[%c0_150, %c0_151, %c3_152, %c0_153, %c0_154] : memref<1x1x4x2x128xf32, #tpu.memory_space<vmem>>, vector<1x1x1x2x128xf32>
    %178 = vector.shape_cast %177 : vector<1x1x1x2x128xf32> to vector<2x128xf32>
    %179 = arith.addf %178, %171 : vector<2x128xf32>
    %c0_155 = arith.constant 0 : index
    %c0_156 = arith.constant 0 : index
    %c3_157 = arith.constant 3 : index
    %c0_158 = arith.constant 0 : index
    %c0_159 = arith.constant 0 : index
    %180 = vector.load %arg5[%c0_155, %c0_156, %c3_157, %c0_158, %c0_159] : memref<1x1x4x2x128xf32, #tpu.memory_space<vmem>>, vector<1x1x1x2x128xf32>
    %181 = vector.shape_cast %180 : vector<1x1x1x2x128xf32> to vector<2x128xf32>
    %182 = vector.shape_cast %179 : vector<2x128xf32> to vector<1x1x1x2x128xf32>
    tpu.vector_store %arg5[%c0_155, %c0_156, %c3_157, %c0_158, %c0_159], %182 {strides = array<i32>} : memref<1x1x4x2x128xf32, #tpu.memory_space<vmem>>, vector<1x1x1x2x128xf32>,
    %c0_160 = arith.constant 0 : index
    %c0_161 = arith.constant 0 : index
    %c3_162 = arith.constant 3 : index
    %c0_163 = arith.constant 0 : index
    %c0_164 = arith.constant 0 : index
    %183 = vector.load %arg6[%c0_160, %c0_161, %c3_162, %c0_163, %c0_164] : memref<1x1x4x2x128xf32, #tpu.memory_space<vmem>>, vector<1x1x1x2x128xf32>
    %184 = vector.shape_cast %183 : vector<1x1x1x2x128xf32> to vector<2x128xf32>
    %185 = arith.addf %184, %175 : vector<2x128xf32>
    %c0_165 = arith.constant 0 : index
    %c0_166 = arith.constant 0 : index
    %c3_167 = arith.constant 3 : index
    %c0_168 = arith.constant 0 : index
    %c0_169 = arith.constant 0 : index
    %186 = vector.load %arg6[%c0_165, %c0_166, %c3_167, %c0_168, %c0_169] : memref<1x1x4x2x128xf32, #tpu.memory_space<vmem>>, vector<1x1x1x2x128xf32>
    %187 = vector.shape_cast %186 : vector<1x1x1x2x128xf32> to vector<2x128xf32>
    %188 = vector.shape_cast %185 : vector<2x128xf32> to vector<1x1x1x2x128xf32>
    tpu.vector_store %arg6[%c0_165, %c0_166, %c3_167, %c0_168, %c0_169], %188 {strides = array<i32>} : memref<1x1x4x2x128xf32, #tpu.memory_space<vmem>>, vector<1x1x1x2x128xf32>,
    %c0_170 = arith.constant 0 : index
    %c0_171 = arith.constant 0 : index
    %c3_172 = arith.constant 3 : index
    %c0_173 = arith.constant 0 : index
    %c0_174 = arith.constant 0 : index
    %189 = vector.load %arg7[%c0_170, %c0_171, %c3_172, %c0_173, %c0_174] : memref<1x1x4x2x128xf32, #tpu.memory_space<vmem>>, vector<1x1x1x2x128xf32>
    %190 = vector.shape_cast %189 : vector<1x1x1x2x128xf32> to vector<2x128xf32>
    %191 = arith.addf %190, %176 : vector<2x128xf32>
    %c0_175 = arith.constant 0 : index
    %c0_176 = arith.constant 0 : index
    %c3_177 = arith.constant 3 : index
    %c0_178 = arith.constant 0 : index
    %c0_179 = arith.constant 0 : index
    %192 = vector.load %arg7[%c0_175, %c0_176, %c3_177, %c0_178, %c0_179] : memref<1x1x4x2x128xf32, #tpu.memory_space<vmem>>, vector<1x1x1x2x128xf32>
    %193 = vector.shape_cast %192 : vector<1x1x1x2x128xf32> to vector<2x128xf32>
    %194 = vector.shape_cast %191 : vector<2x128xf32> to vector<1x1x1x2x128xf32>
    tpu.vector_store %arg7[%c0_175, %c0_176, %c3_177, %c0_178, %c0_179], %194 {strides = array<i32>} : memref<1x1x4x2x128xf32, #tpu.memory_space<vmem>>, vector<1x1x1x2x128xf32>,
    return
  }
  func.func @transform_0(%arg0: i32, %arg1: i32, %arg2: i32) -> (i32, i32, i32, i32) {
    %c1_i32 = arith.constant 1 : i32
    %0 = arith.muli %arg1, %c1_i32 : i32
    %1 = arith.addi %0, %arg2 : i32
    %c0_i32 = arith.constant 0 : i32
    %c0_i32_0 = arith.constant 0 : i32
    %c0_i32_1 = arith.constant 0 : i32
    return %arg0, %c0_i32, %1, %c0_i32_0 : i32, i32, i32, i32
  }
  func.func @transform_1(%arg0: i32, %arg1: i32, %arg2: i32) -> (i32, i32, i32) {
    %c1_i32 = arith.constant 1 : i32
    %0 = arith.muli %arg1, %c1_i32 : i32
    %1 = arith.addi %0, %arg2 : i32
    %c0_i32 = arith.constant 0 : i32
    %c0_i32_0 = arith.constant 0 : i32
    return %arg0, %1, %c0_i32 : i32, i32, i32
  }
  func.func @transform_2(%arg0: i32, %arg1: i32, %arg2: i32) -> (i32, i32, i32, i32, i32) {
    %c0_i32 = arith.constant 0 : i32
    %c0_i32_0 = arith.constant 0 : i32
    %c0_i32_1 = arith.constant 0 : i32
    %c0_i32_2 = arith.constant 0 : i32
    return %arg0, %arg1, %c0_i32, %c0_i32_0, %c0_i32_1 : i32, i32, i32, i32, i32
  }
  func.func @transform_3(%arg0: i32, %arg1: i32, %arg2: i32) -> (i32, i32, i32, i32, i32) {
    %c0_i32 = arith.constant 0 : i32
    %c0_i32_0 = arith.constant 0 : i32
    %c0_i32_1 = arith.constant 0 : i32
    %c0_i32_2 = arith.constant 0 : i32
    return %arg0, %arg1, %c0_i32, %c0_i32_0, %c0_i32_1 : i32, i32, i32, i32, i32
  }
  func.func @transform_4(%arg0: i32, %arg1: i32, %arg2: i32) -> (i32, i32, i32, i32, i32) {
    %c0_i32 = arith.constant 0 : i32
    %c0_i32_0 = arith.constant 0 : i32
    %c0_i32_1 = arith.constant 0 : i32
    %c0_i32_2 = arith.constant 0 : i32
    return %arg0, %arg1, %c0_i32, %c0_i32_0, %c0_i32_1 : i32, i32, i32, i32, i32
  }
}

</mosaic_0001>

<bundles_post_ra>
// kernel: tpu_custom_call.1
= control target key start
LH: loop header
LB: loop body
LE: loop exit
PB: predicated region body
PF: predicated region fallthrough
CT: control target
= control target key end

     0   :  { %s1505_s0 = inlined_call_operand.hbm [shape: f32[2,4,2,128], index: 0, kind: input, shape index: {}]   ;;  %s1506_s1 = inlined_call_operand.hbm [shape: s32[2,2,128], index: 1, kind: input, shape index: {}]   ;;  %s1507_s2 = inlined_call_operand.hbm [shape: f32[2,1,4,2,128], index: 2, kind: output, shape index: {0}]   ;;  %s1508_s3 = inlined_call_operand.hbm [shape: f32[2,1,4,2,128], index: 3, kind: output, shape index: {1}]   ;;  %s1509_s4 = inlined_call_operand.hbm [shape: f32[2,1,4,2,128], index: 4, kind: output, shape index: {2}]  }
   0x1   :  { %1513 = sst [smem:[#allocation15_spill]] %s1505_s0 }
   0x2   :  { %10 = vsyncpa [#allocation3], 0 }
   0x3   :  { %12 = vsyncpa [#allocation3 + $0x1], 0 }
   0x4   :  { %13 = vsyncpa [#allocation6], 0 }
   0x5   :  { %15 = vsyncpa [#allocation6 + $0x1], 0 }
   0x6   :  { %16 = vsyncpa [#allocation4], 0 }
   0x7   :  { %18 = vsyncpa [#allocation4 + $0x1], 0 }
   0x8   :  { %19 = vsyncpa [#allocation9], 0 }
   0x9   :  { %21 = vsyncpa [#allocation9 + $0x1], 0  ;;  %s1090_s15 = smov 0   ;;  %s1092_s16 = smov 0  }
   0xa   :  { %s1094_s17 = smov 0   ;;  %s1096_s18 = smov 0  }
   0xb   :  { %s1098_s19 = smov 0   ;;  %s1100_s20 = smov 0  }
   0xc LB: > { %s1121_s21 = sadd.s32 4294967295, %s1053_s20   ;;  %s1511_s22 = sadd.s32 4294967294, %s1053_s20   ;;  %s1053_s20 = sphi %s1100_s20, %s27_s20   ;;  %s1049_s19 = sphi %s1098_s19, %s1532_s19   ;;  %s1045_s18 = sphi %s1096_s18, %s1531_s18   ;;  %s1041_s17 = sphi %s1094_s17, %s1530_s17   ;;  %s1037_s16 = sphi %s1092_s16, %s1529_s16   ;;  %s1033_s15 = sphi %s1090_s15, %s1528_s15  }
   0xd   : > { %s46_s23 = sadd.s32 1, %s1049_s19  ;;  %s57_s24 = sadd.s32 1, %s1041_s17 }
   0xe   : > { %p48_p0 = scmp.ge.s32.totalorder %s46_s23, 2  ;;  %p64_p1 = scmp.ne.s32.totalorder %s1041_s17, %s1037_s16 }
   0xf   : > { %p65_p2 = scmp.eq.s32.totalorder %s1053_s20, 0  ;;  %p70_p3 = scmp.ne.s32.totalorder %s1037_s16, %s1033_s15 }
  0x10   : > { %s1534_s23 = smov (%p48_p0, %s46_s23), 0  ;;  %p71_p5 = scmp.eq.s32.totalorder %s1121_s21, 0 }
  0x11   : > { %p1133_p4 = por %p65_p2, %p64_p1  ;;  %s52_s26 = ssub.s32 %s1049_s19, %s1534_s23 }
  0x12   : > { %p126_p6 = scmp.eq.s32.totalorder %s1121_s21, 1  ;;  %p55_p7 = scmp.eq.s32.totalorder %s52_s26, 0 }
  0x13   : > { %p1141_p8 = por %p71_p5, %p70_p3  ;;  %p132_p10 = scmp.eq.s32.totalorder %s1511_s22, 1 }
  0x14   : > { %p1145_p9 = por %p126_p6, %p64_p1  ;;  %p776_p13 = scmp.lt.s32.totalorder %s1053_s20, 2 }
  0x15   : > { %s1515_s27 = scalar_select %p1141_p8, 1, 0 }
  0x16   : > { %s1516_s28 = scalar_select %p1145_p9, 1, 0 }
  0x17   : > { %s1152_s29 = scalar_select %p55_p7, %s1041_s17, %s57_s24  }
  0x18   : > { %p1154_p11 = por %p132_p10, %p70_p3  ;;  %s1161_s5 = sand.u32 1, %s1041_s17  }
  0x19   : > { %s702_s6 = sshll.u32 %s1161_s5, 3  ;;  %s745_s7 = sshll.u32 %s1049_s19, 7 }
  0x1a   : > { %s1517_s30 = scalar_select %p1154_p11, 1, 0 }
  0x1b   : > { %s1518_s0 = sld [smem:[#allocation15_spill]]  ;;  %s212_s11 = scalar_lea.vmem [#allocation2], %s702_s6 }
  0x1c   : > { %s221_s12 = sshll.u32 %s212_s11, 4  ;;  %p1174_p0 = pnand %p776_p13, %p1133_p4  ;;  %s1170_s12 = int_to_ptr.vmem [resolvable:$true] %s221_s12 }
  0x1d   : > { %s209_s14 = scalar_lea.sflag [#allocation3], %s1161_s5 }
  0x1e   : > { %p849_p3 = pneg %p1174_p0 }
  0x21   : > { %s1168_s10 = scalar_lea.hbm %s1518_s0, %s745_s7  ;;  %s852_s25 = scalar_lea.hbm %s1518_s0, 256 }
  0x22   : > { %s847_s24 = scalar_lea.hbm %s1168_s10, 128  ;;  %p853_p4 = scmp.lt.u32.totalorder %s1168_s10, %s1518_s0 }
  0x23   : > { %p848_p2 = scmp.ne.s32.totalorder %s1168_s10, %s847_s24  ;;  %p854_p7 = scmp.lt.u32.totalorder %s852_s25, %s847_s24 }
  0x24   : > { %p856_p13 = scmp.lt.u32.totalorder %s847_s24, %s1168_s10 }
  0x25   : > { %p850_p5 = pnand %p849_p3, %p848_p2  ;;  %p855_p10 = por %p854_p7, %p853_p4 }
  0x27   : > { %p851_p6 = pneg %p850_p5  ;;  %p857_p12 = por %p856_p13, %p855_p10 }
  0x29   : > { %p858_p1 = pnand %p857_p12, %p851_p6 }
  0x2b   : > { %861 = shalt.err (!%p858_p1)
}
  0x2c   : > { %s862_s9 = scalar_lea.vmem %s1170_s12, 128  ;;  %s1055_s11 = smov [#allocation2]  }
  0x2d   : > { %p863_p2 = scmp.ne.s32.totalorder %s1170_s12, %s862_s9  ;;  %s867_s26 = sshll.u32 %s1055_s11, 4  ;;  %s868_s26 = int_to_ptr.vmem [resolvable:$false] %s867_s26 }
  0x2e   : > { %s869_s6 = scalar_lea.vmem %s868_s26, 256  ;;  %p870_p9 = scmp.lt.s32.totalorder %s1170_s12, %s868_s26 }
  0x2f   : > { %p865_p5 = pnand %p863_p2, %p849_p3  ;;  %p871_p4 = scmp.lt.s32.totalorder %s869_s6, %s862_s9 }
  0x31   : > { %p866_p11 = pneg %p865_p5  ;;  %p872_p7 = por %p871_p4, %p870_p9 }
  0x33   : > { %p873_p10 = pnand %p872_p7, %p866_p11 }
  0x35   : > { %876 = shalt.err (!%p873_p10)
}
  0x36   : > { %s1056_s24 = smov 32   ;;  %s1057_s25 = smov 2  }
  0x37   : > { %762 = dma.hbm_to_vmem [thread:$0]  (!%p1174_p0), %s1168_s10, 128, %s1170_s12, %s209_s14, %s1056_s24, %s1056_s24, %s1057_s25  }
  0x38   : > { %p249_p12 = scmp.lt.s32.totalorder %s1053_s20, 3  ;;  %s705_s7 = sshll.u32 %s1161_s5, 1 }
  0x39   : > { %s706_s8 = sshll.u32 %s1049_s19, 5  ;;  %p1520_p9 = scmp.ge.s32.totalorder %s1053_s20, 1 }
  0x3a   : > { %s1219_s6 = scalar_lea.hbm %s1506_s1, %s706_s8  ;;  %s235_s22 = scalar_lea.vmem [#allocation5], %s705_s7 }
  0x3b   : > { %p1212_p11 = pnand %p1520_p9, %p249_p12  ;;  %s244_s0 = sshll.u32 %s235_s22, 4  ;;  %s245_s0 = int_to_ptr.vmem [resolvable:$true] %s244_s0 }
  0x3c   : > { %s232_s10 = scalar_lea.sflag [#allocation6], %s1161_s5  ;;  %s877_s12 = scalar_lea.hbm %s1219_s6, 32 }
  0x3d   : > { %s1521_s9 = scalar_select %p1212_p11, 1, 0 }
  0x3e   : > { %p878_p1 = scmp.ne.s32.totalorder %s1219_s6, %s877_s12  ;;  %s882_s25 = scalar_lea.hbm %s1506_s1, 64 }
  0x3f   : > { %p883_p2 = scmp.lt.u32.totalorder %s1219_s6, %s1506_s1  ;;  %p884_p5 = scmp.lt.u32.totalorder %s882_s25, %s877_s12 }
  0x40   : > { %p880_p6 = pnand %p878_p1, %p849_p3  ;;  %p886_p7 = scmp.lt.u32.totalorder %s877_s12, %s1219_s6 }
  0x41   : > { %p885_p4 = por %p884_p5, %p883_p2 }
  0x42   : > { %p881_p13 = pneg %p880_p6 }
  0x43   : > { %p887_p10 = por %p886_p7, %p885_p4 }
  0x45   : > { %p888_p12 = pnand %p887_p10, %p881_p13 }
  0x47   : > { %891 = shalt.err (!%p888_p12)
}
  0x48   : > { %s892_s22 = scalar_lea.vmem %s245_s0, 32  ;;  %s1058_s5 = smov [#allocation5]  }
  0x49   : > { %p893_p9 = scmp.ne.s32.totalorder %s245_s0, %s892_s22  ;;  %s897_s7 = sshll.u32 %s1058_s5, 4  ;;  %s898_s7 = int_to_ptr.vmem [resolvable:$false] %s897_s7 }
  0x4a   : > { %s899_s26 = scalar_lea.vmem %s898_s7, 64  ;;  %p900_p8 = scmp.lt.s32.totalorder %s245_s0, %s898_s7 }
  0x4b   : > { %p895_p1 = pnand %p893_p9, %p849_p3  ;;  %p901_p11 = scmp.lt.s32.totalorder %s899_s26, %s892_s22 }
  0x4d   : > { %p896_p6 = pneg %p895_p1  ;;  %p902_p2 = por %p901_p11, %p900_p8 }
  0x4f   : > { %p903_p5 = pnand %p902_p2, %p896_p6 }
  0x51   : > { %906 = shalt.err (!%p903_p5)
}
  0x52   : > { %765 = dma.hbm_to_vmem [thread:$0]  (!%p1174_p0), %s1219_s6, 32, %s245_s0, %s232_s10  }
  0x53   : > { %p1522_p13 = scmp.ne.s32.totalorder %s1521_s9, 0 }
  0x54   : > { %s1244_s12 = sand.u32 (!%p1522_p13), 1, %s1037_s16   ;;  %p1523_p8 = scmp.ne.s32.totalorder (!%p1522_p13), %s1515_s27, 0 }
  0x55   : > { %253 = sbr.rel (%p1522_p13) target bundleno = 204 (0xcc), region = 28  ;;  %s708_s14 = sshll.u32 (!%p1522_p13), %s1244_s12, 3 }
  0x56   : > { %s256_s24 = scalar_lea.sflag (!%p1522_p13), [#allocation3], %s1244_s12  ;;  %s1248_s25 = scalar_lea.vmem (!%p1522_p13), [#allocation2], %s708_s14 }
  0x5c   : > { %1016 = dma.done.wait (%p1523_p8), %s256_s24, 128  }
  0x5d   : > { %1018 = vsyncadd (%p1523_p8), %s256_s24, 4294967168  ;;  %s709_s0 = sshll.u32 %s1244_s12, 1  ;;  %s265_s13 = scalar_lea.sflag [#allocation6], %s1244_s12 }
  0x5e   : > { %s1256_s9 = scalar_lea.vmem [#allocation5], %s709_s0 }
  0x5f   : > { %1020 = dma.done.wait (%p1523_p8), %s265_s13, 32  }
  0x60   : > { %1022 = vsyncadd (%p1523_p8), %s265_s13, 4294967264  ;;  %s1262_s6 = scalar_lea.vmem [#allocation8], %s708_s14  ;;  %v1059_v0 = vmov 0.0   ;;  %s1268_s10 = scalar_lea.vmem [#allocation7], %s708_s14  ;;  %v1282_v1 = vld [vmem:[%s1256_s9] sm:$0x3] }
  0x61   : > { %318 = vst [vmem:[%s1262_s6] sm:$0x3] %v1059_v0  ;;  %319 = vst [vmem:[%s1262_s6 + $0x2] sm:$0x3] %v1059_v0  ;;  %s1274_s27 = scalar_lea.vmem [#allocation10], %s708_s14  ;;  %s459_s8 = sand.u32 1, %s1121_s21   ;;  %vm328_vm0 = vcmp.eq.s32.totalorder %v1282_v1, 1 }
  0x62   : > { %320 = vst [vmem:[%s1262_s6 + $0x4] sm:$0x3] %v1059_v0  ;;  %321 = vst [vmem:[%s1262_s6 + $0x6] sm:$0x3] %v1059_v0  ;;  %v1285_v2 = vld [vmem:[%s1256_s9] sm:$0x3] }
  0x63   : > { %314 = vst [vmem:[%s1268_s10] sm:$0x3] %v1059_v0  ;;  %315 = vst [vmem:[%s1268_s10 + $0x2] sm:$0x3] %v1059_v0  ;;  %v1288_v3 = vld [vmem:[%s1256_s9] sm:$0x3]  ;;  %vm358_vm1 = vcmp.eq.s32.totalorder %v1285_v2, 2 }
  0x64   : > { %316 = vst [vmem:[%s1268_s10 + $0x4] sm:$0x3] %v1059_v0  ;;  %317 = vst [vmem:[%s1268_s10 + $0x6] sm:$0x3] %v1059_v0  ;;  %v343_v6 = vsel %vm328_vm0, 1.0, %v1059_v0  ;;  %v373_v7 = vsel %vm358_vm1, 1.0, %v1059_v0 }
  0x65   : > { %322 = vst [vmem:[%s1274_s27] sm:$0x3] %v1059_v0  ;;  %323 = vst [vmem:[%s1274_s27 + $0x2] sm:$0x3] %v1059_v0  ;;  %vm391_vm2 = vcmp.eq.s32.totalorder %v1288_v3, 3  ;;  %s1301_s11 = sshll.u32 %s1045_s18, 7  ;;  %s498_s22 = sshll.u32 %s1262_s6, 4  ;;  %s1329_s22 = int_to_ptr.vmem [resolvable:$true] %s498_s22 }
  0x66   : > { %324 = vst [vmem:[%s1274_s27 + $0x4] sm:$0x3] %v1059_v0  ;;  %325 = vst [vmem:[%s1274_s27 + $0x6] sm:$0x3] %v1059_v0  ;;  %v406_v11 = vsel %vm391_vm2, 1.0, %v1059_v0  ;;  %s1327_s7 = scalar_lea.hbm %s1508_s3, %s1301_s11  ;;  %s1338_s26 = scalar_lea.sflag [#allocation9], %s459_s8 }
  0x67   : > { %v1306_v12 = vld [vmem:[%s1256_s9] sm:$0x3]  ;;  %v1312_v15 = vld [vmem:[%s1248_s25] sm:$0x3]  ;;  %v1321_v19 = vld [vmem:[%s1248_s25 + $0x2] sm:$0x3] }
  0x68   : > { %v349_v4 = vld [vmem:[%s1262_s6] sm:$0x3]  ;;  %v716_v5 = vld [vmem:[%s1262_s6 + $0x2] sm:$0x3]  ;;  %vm424_vm3 = vcmp.eq.s32.totalorder %v1306_v12, 4  ;;  %s907_s14 = scalar_lea.vmem %s1329_s22, 128 }
  0x69   : > { %v723_v8 = vld [vmem:[%s1262_s6 + $0x4] sm:$0x3]  ;;  %v350_v9 = vadd.f32 %v349_v4, %v343_v6  ;;  %v382_v10 = vadd.f32 %v716_v5, %v373_v7  ;;  %v730_v13 = vld [vmem:[%s1262_s6 + $0x6] sm:$0x3]  ;;  %v439_v16 = vsel %vm424_vm3, 1.0, %v1059_v0  ;;  %p908_p0 = scmp.ne.s32.totalorder %s1329_s22, %s907_s14  ;;  %p1524_p3 = scmp.ne.s32.totalorder %s1516_s28, 0 }
  0x6a   : > { %v415_v14 = vadd.f32 %v723_v8, %v406_v11  ;;  %v331_v17 = vand.u32 2147483647, %v1312_v15  ;;  %v448_v18 = vadd.f32 %v730_v13, %v439_v16  ;;  %v361_v21 = vand.u32 2147483647, %v1321_v19  ;;  %v1334_v22 = vld [vmem:[%s1248_s25 + $0x4] sm:$0x3] }
  0x6b   : > { %351 = vst [vmem:[%s1262_s6] sm:$0x3] %v350_v9  ;;  %717 = vst [vmem:[%s1262_s6 + $0x2] sm:$0x3] %v382_v10  ;;  %p909_p11 = pnand %p908_p0, %p1524_p3  ;;  %s1060_s24 = smov [#allocation8]  }
  0x6c   : > { %724 = vst [vmem:[%s1262_s6 + $0x4] sm:$0x3] %v415_v14  ;;  %v332_v20 = vsub.f32 0.0, %v331_v17  ;;  %731 = vst [vmem:[%s1262_s6 + $0x6] sm:$0x3] %v448_v18  ;;  %v362_v24 = vsub.f32 0.0, %v361_v21 }
  0x6d   : > { %p910_p4 = pneg %p909_p11  ;;  %s911_s0 = sshll.u32 %s1060_s24, 4  ;;  %s912_s0 = int_to_ptr.vmem [resolvable:$false] %s911_s0 }
  0x6e   : > { %v333_v23 = vmul.f32 1.442695, %v332_v20  ;;  %s913_s13 = scalar_lea.vmem %s912_s0, 256  ;;  %p914_p7 = scmp.lt.s32.totalorder %s1329_s22, %s912_s0 }
  0x6f   : > { %p915_p10 = scmp.lt.s32.totalorder %s913_s13, %s907_s14 }
  0x71   : > { %p916_p12 = por %p915_p10, %p914_p7 }
  0x73   : > { %p917_p9 = pnand %p916_p12, %p910_p4 }
  0x75   : > { %920 = shalt.err (!%p917_p9)
}
  0x76   : > { %s921_s21 = scalar_lea.hbm %s1327_s7, 128  ;;  %s925_s8 = scalar_lea.hbm %s1508_s3, 256 }
  0x77   : > { %p922_p1 = scmp.ne.s32.totalorder %s1327_s7, %s921_s21  ;;  %p926_p5 = scmp.lt.u32.totalorder %s1327_s7, %s1508_s3 }
  0x78   : > { %p927_p13 = scmp.lt.u32.totalorder %s925_s8, %s921_s21  ;;  %p929_p0 = scmp.lt.u32.totalorder %s921_s21, %s1327_s7 }
  0x79   : > { %p923_p6 = pnand %p922_p1, %p1524_p3 }
  0x7a   : > { %p928_p8 = por %p927_p13, %p926_p5 }
  0x7b   : > { %p924_p2 = pneg %p923_p6 }
  0x7c   : > { %p930_p11 = por %p929_p0, %p928_p8 }
  0x7e   : > { %p931_p4 = pnand %p930_p11, %p924_p2 }
  0x80   : > { %934 = shalt.err (!%p931_p4)
}
  0x81   : > { %s1061_s14 = smov 32   ;;  %s1062_s24 = smov 2   ;;  %v394_v25 = vand.u32 2147483647, %v1334_v22  ;;  %v1367_v26 = vld [vmem:[%s1248_s25 + $0x6] sm:$0x3]  ;;  %831 = vpow2.f32 %v333_v23 }
  0x82   : > { %754 = dma.vmem_to_hbm [thread:$0]  (%p1524_p3), %s1329_s22, 128, %s1327_s7, %s1338_s26, %s1061_s14, %s1061_s14, %s1062_s24   ;;  %v363_v27 = vmul.f32 1.442695, %v362_v24  ;;  %v427_v29 = vand.u32 2147483647, %v1367_v26  ;;  %v329_v40 = vsub.f32 0.0, %v1312_v15 }
  0x83   : > { %v395_v28 = vsub.f32 0.0, %v394_v25  ;;  %v359_v42 = vsub.f32 0.0, %v1321_v19  ;;  %v392_v45 = vsub.f32 0.0, %v1334_v22  ;;  %v425_v49 = vsub.f32 0.0, %v1367_v26  ;;  %v346_v51 = vld [vmem:[%s1268_s10] sm:$0x3]  ;;  %s1411_s13 = scalar_lea.hbm %s1507_s2, %s1301_s11  ;;  %s1423_s6 = scalar_lea.hbm %s1509_s4, %s1301_s11 }
  0x84   : > { %833 = vpow2.f32 %v363_v27  ;;  %v428_v31 = vsub.f32 0.0, %v427_v29  ;;  %v330_v43 = vmax.f32 %v329_v40, 0.0  ;;  %v352_v57 = vld [vmem:[%s1274_s27] sm:$0x3]  ;;  %v714_v59 = vld [vmem:[%s1268_s10 + $0x2] sm:$0x3] }
  0x85   : > { %v396_v30 = vmul.f32 1.442695, %v395_v28  ;;  %v360_v47 = vmax.f32 %v359_v42, 0.0  ;;  %v393_v53 = vmax.f32 %v392_v45, 0.0  ;;  %v426_v62 = vmax.f32 %v425_v49, 0.0  ;;  %s480_s25 = sshll.u32 %s1268_s10, 4  ;;  %s1413_s25 = int_to_ptr.vmem [resolvable:$true] %s480_s25 }
  0x86   : > { %v429_v32 = vmul.f32 1.442695, %v428_v31  ;;  %v718_v6 = vld [vmem:[%s1274_s27 + $0x2] sm:$0x3]  ;;  %v721_v10 = vld [vmem:[%s1268_s10 + $0x4] sm:$0x3] }
  0x87   : > { %835 = vpow2.f32 %v396_v30  ;;  %v725_v16 = vld [vmem:[%s1274_s27 + $0x4] sm:$0x3]  ;;  %v728_v18 = vld [vmem:[%s1268_s10 + $0x6] sm:$0x3]  ;;  %s516_s22 = sshll.u32 %s1274_s27, 4  ;;  %s455_s8 = scalar_lea.sflag [#allocation4], %s1244_s12  ;;  %s1425_s22 = int_to_ptr.vmem [resolvable:$true] %s516_s22 }
  0x88   : > { %837 = vpow2.f32 %v429_v32  ;;  %v732_v23 = vld [vmem:[%s1274_s27 + $0x6] sm:$0x3]  ;;  %s935_s18 = scalar_lea.vmem %s1413_s25, 128  ;;  %s1063_s5 = smov [#allocation7]  }
  0x89   : > { %p936_p7 = scmp.ne.s32.totalorder %s1413_s25, %s935_s18  ;;  %s939_s7 = sshll.u32 %s1063_s5, 4  ;;  %s940_s7 = int_to_ptr.vmem [resolvable:$false] %s939_s7 }
  0x8a   : > { %s941_s0 = scalar_lea.vmem %s940_s7, 256  ;;  %p942_p9 = scmp.lt.s32.totalorder %s1413_s25, %s940_s7 }
  0x8b   : > { %v832_v33 = vpop.eup %831  ;;  %p937_p10 = pnand %p936_p7, %p1524_p3  ;;  %p943_p1 = scmp.lt.s32.totalorder %s941_s0, %s935_s18 }
  0x8c   : > { %v335_v34 = vadd.f32 1.0, %v832_v33 }
  0x8d   : > { %p938_p12 = pneg %p937_p10  ;;  %p944_p6 = por %p943_p1, %p942_p9 }
  0x8e   : > { %v834_v35 = vpop.eup %833  ;;  %839 = vlog2.f32 %v335_v34 }
  0x8f   : > { %v365_v36 = vadd.f32 1.0, %v834_v35  ;;  %p945_p2 = pnand %p944_p6, %p938_p12 }
  0x91   : > { %v836_v37 = vpop.eup %835  ;;  %841 = vlog2.f32 %v365_v36 }
  0x92   : > { %v398_v38 = vadd.f32 1.0, %v836_v37  ;;  %v838_v39 = vpop.eup %837 }
  0x93   : > { %v431_v41 = vadd.f32 1.0, %v838_v39 }
  0x94   : > { %843 = vlog2.f32 %v398_v38 }
  0x95   : > { %845 = vlog2.f32 %v431_v41 }
  0x98   : > { %v840_v44 = vpop.eup %839 }
  0x99   : > { %v337_v46 = vmul.f32 0.6931472, %v840_v44 }
  0x9b   : > { %v842_v48 = vpop.eup %841  ;;  %v338_v50 = vadd.f32 %v337_v46, %v330_v43 }
  0x9c   : > { %v367_v52 = vmul.f32 0.6931472, %v842_v48 }
  0x9d   : > { %v341_v55 = vsel %vm328_vm0, %v338_v50, 0.0  ;;  %v339_v56 = vadd.f32 %v338_v50, %v1312_v15 }
  0x9e   : > { %v844_v54 = vpop.eup %843  ;;  %v368_v58 = vadd.f32 %v367_v52, %v360_v47  ;;  %v347_v60 = vadd.f32 %v346_v51, %v341_v55 }
  0x9f   : > { %v400_v61 = vmul.f32 0.6931472, %v844_v54  ;;  %v846_v63 = vpop.eup %845  ;;  %v340_v0 = vsel %vm328_vm0, 0.0, %v339_v56 }
  0xa0   : > { %v371_v4 = vsel %vm358_vm1, %v368_v58, 0.0  ;;  %v369_v5 = vadd.f32 %v1321_v19, %v368_v58  ;;  %348 = vst [vmem:[%s1268_s10] sm:$0x3] %v347_v60  ;;  %v353_v7 = vadd.f32 %v352_v57, %v340_v0  ;;  %v433_v11 = vmul.f32 0.6931472, %v846_v63 }
  0xa1   : > { %v378_v8 = vadd.f32 %v714_v59, %v371_v4  ;;  %v401_v9 = vadd.f32 %v400_v61, %v393_v53 }
  0xa2   : > { %v370_v1 = vsel %vm358_vm1, 0.0, %v369_v5  ;;  %354 = vst [vmem:[%s1274_s27] sm:$0x3] %v353_v7  ;;  %v434_v17 = vadd.f32 %v433_v11, %v426_v62 }
  0xa3   : > { %715 = vst [vmem:[%s1268_s10 + $0x2] sm:$0x3] %v378_v8  ;;  %v386_v13 = vadd.f32 %v718_v6, %v370_v1  ;;  %v404_v14 = vsel %vm391_vm2, %v401_v9, 0.0  ;;  %v402_v15 = vadd.f32 %v1334_v22, %v401_v9 }
  0xa4   : > { %v411_v2 = vadd.f32 %v721_v10, %v404_v14  ;;  %v437_v20 = vsel %vm424_vm3, %v434_v17, 0.0  ;;  %v435_v21 = vadd.f32 %v1367_v26, %v434_v17 }
  0xa5   : > { %719 = vst [vmem:[%s1274_s27 + $0x2] sm:$0x3] %v386_v13  ;;  %v403_v19 = vsel %vm391_vm2, 0.0, %v402_v15  ;;  %v444_v24 = vadd.f32 %v728_v18, %v437_v20 }
  0xa6   : > { %722 = vst [vmem:[%s1268_s10 + $0x4] sm:$0x3] %v411_v2  ;;  %v419_v22 = vadd.f32 %v725_v16, %v403_v19  ;;  %v436_v3 = vsel %vm424_vm3, 0.0, %v435_v21 }
  0xa7   : > { %729 = vst [vmem:[%s1268_s10 + $0x6] sm:$0x3] %v444_v24  ;;  %v452_v25 = vadd.f32 %v732_v23, %v436_v3 }
  0xa8   : > { %726 = vst [vmem:[%s1274_s27 + $0x4] sm:$0x3] %v419_v22 }
  0xa9   : > { %948 = shalt.err (!%p945_p2)
}
  0xaa   : > { %s949_s10 = scalar_lea.hbm %s1411_s13, 128  ;;  %s953_s9 = scalar_lea.hbm %s1507_s2, 256 }
  0xab   : > { %p950_p5 = scmp.ne.s32.totalorder %s1411_s13, %s949_s10  ;;  %p954_p0 = scmp.lt.u32.totalorder %s1411_s13, %s1507_s2 }
  0xac   : > { %p955_p11 = scmp.lt.u32.totalorder %s953_s9, %s949_s10  ;;  %p957_p7 = scmp.lt.u32.totalorder %s949_s10, %s1411_s13 }
  0xad   : > { %p951_p13 = pnand %p950_p5, %p1524_p3 }
  0xae   : > { %p956_p4 = por %p955_p11, %p954_p0 }
  0xaf   : > { %p952_p8 = pneg %p951_p13 }
  0xb0   : > { %p958_p10 = por %p957_p7, %p956_p4 }
  0xb2   : > { %p959_p12 = pnand %p958_p10, %p952_p8 }
  0xb4   : > { %962 = shalt.err (!%p959_p12)
}
  0xb5   : > { %753 = dma.vmem_to_hbm [thread:$0]  (%p1524_p3), %s1413_s25, 128, %s1411_s13, %s455_s8, %s1061_s14, %s1061_s14, %s1062_s24  }
  0xb6   : > { %733 = vst [vmem:[%s1274_s27 + $0x6] sm:$0x3] %v452_v25  ;;  %s963_s18 = scalar_lea.vmem %s1425_s22, 128  ;;  %s1064_s0 = smov [#allocation10]  }
  0xb7   : > { %p964_p9 = scmp.ne.s32.totalorder %s1425_s22, %s963_s18  ;;  %s967_s10 = sshll.u32 %s1064_s0, 4  ;;  %s968_s10 = int_to_ptr.vmem [resolvable:$false] %s967_s10 }
  0xb8   : > { %s969_s11 = scalar_lea.vmem %s968_s10, 256  ;;  %p970_p2 = scmp.lt.s32.totalorder %s1425_s22, %s968_s10 }
  0xb9   : > { %p965_p1 = pnand %p964_p9, %p1524_p3  ;;  %p971_p5 = scmp.lt.s32.totalorder %s969_s11, %s963_s18 }
  0xbb   : > { %p966_p6 = pneg %p965_p1  ;;  %p972_p13 = por %p971_p5, %p970_p2 }
  0xbd   : > { %p973_p8 = pnand %p972_p13, %p966_p6 }
  0xbf   : > { %976 = shalt.err (!%p973_p8)
}
  0xc0   : > { %s977_s12 = scalar_lea.hbm %s1423_s6, 128  ;;  %s981_s13 = scalar_lea.hbm %s1509_s4, 256 }
  0xc1   : > { %p978_p0 = scmp.ne.s32.totalorder %s1423_s6, %s977_s12  ;;  %p982_p7 = scmp.lt.u32.totalorder %s1423_s6, %s1509_s4 }
  0xc2   : > { %p983_p10 = scmp.lt.u32.totalorder %s981_s13, %s977_s12  ;;  %p985_p9 = scmp.lt.u32.totalorder %s977_s12, %s1423_s6 }
  0xc3   : > { %p979_p11 = pnand %p978_p0, %p1524_p3 }
  0xc4   : > { %p984_p12 = por %p983_p10, %p982_p7 }
  0xc5   : > { %p980_p4 = pneg %p979_p11 }
  0xc6   : > { %p986_p1 = por %p985_p9, %p984_p12 }
  0xc8   : > { %p987_p6 = pnand %p986_p1, %p980_p4 }
  0xca   : > { %990 = shalt.err (!%p987_p6)
}
  0xcb   : > { %755 = dma.vmem_to_hbm [thread:$0]  (%p1524_p3), %s1425_s22, 128, %s1423_s6, %s1338_s26, %s1061_s14, %s1061_s14, %s1062_s24  }
  0xcc PF: > { %s531_s9 = sand.u32 1, %s1033_s15   ;;  %p1525_p2 = scmp.ne.s32.totalorder %s1517_s30, 0 }
  0xcd   : > { %p1526_p5 = scmp.ge.s32.totalorder %s1053_s20, 2  ;;  %s532_s5 = scalar_lea.sflag [#allocation4], %s531_s9 }
  0xcf   : > { %p767_p13 = pnand %p1526_p5, %p1525_p2 }
  0xd1   : > { %1024 = dma.done.wait (!%p767_p13), %s532_s5, 128  }
  0xd2   : > { %1026 = vsyncadd (!%p767_p13), %s532_s5, 4294967168  ;;  %s1527_s28 = sadd.s32 4294967294, %s1053_s20  }
  0xd3   : > { %s540_s7 = sand.u32 1, %s1527_s28  }
  0xd4   : > { %s541_s18 = scalar_lea.sflag [#allocation9], %s540_s7 }
  0xd5   : > { %1028 = dma.done.wait (!%p767_p13), %s541_s18, 256  }
  0xd6   : > { %1030 = vsyncadd (!%p767_p13), %s541_s18, 4294967040  ;;  %s27_s20 = sadd.s32 1, %s1053_s20   ;;  %s1528_s15 = smov %s1037_s16 }
  0xd7   : > { %p24_p3 = scmp.ge.s32.totalorder %s27_s20, 4   ;;  %s1529_s16 = smov %s1041_s17 }
  0xd8   : > { %s1530_s17 = smov %s1152_s29  ;;  %s1531_s18 = smov %s1049_s19 }
  0xd9   : > { %s1532_s19 = smov %s1534_s23  ;;  %26 = sbr.rel (!%p24_p3) target bundleno = 12 (0xc), region = 134 }
  0xe0   :  { %555 = vsyncpa [#allocation3], 1 }
  0xe1   :  { %557 = vsyncpa [#allocation3 + $0x1], 1 }
  0xe2   :  { %558 = vsyncpa [#allocation6], 1 }
  0xe3   :  { %560 = vsyncpa [#allocation6 + $0x1], 1 }
  0xe4   :  { %561 = vsyncpa [#allocation4], 1 }
  0xe5   :  { %563 = vsyncpa [#allocation4 + $0x1], 1 }
  0xe6   :  { %564 = vsyncpa [#allocation9], 1 }
  0xe7   :  { %566 = vsyncpa [#allocation9 + $0x1], 1 }

</bundles_post_ra>
